<compile_context>
chip_gen: v5e
topology: v5e:2x2
jax: 0.10.0
libtpu: 0.0.40
codegen_flags: <defaults>
</compile_context>

<pallas_src>
import functools
import math

import jax
import jax.numpy as jnp
from jax.experimental import pallas as pl
from jax.experimental.pallas import tpu as pltpu

_LANE = 128
_SUBLANE = 8
_MATMUL_DTYPE = jnp.bfloat16   # MXU-native on v6e/v7x; f32 accumulation keeps accuracy.


def _round_up(x, m):
    return ((x + m - 1) // m) * m


def _fused_kernel(x_ref, w1_ref, b1_ref, wh_ref, bh_ref, out_ref, *, num_act):
    """hidden = relu(x@W1+b1); logits = h@[Wp|Wv|0]; out = [softmax(policy) | value | 0]."""
    # Encoder: (TN, Fp) @ (Fp, Hp) -> (TN, Hp), bf16 operands, f32 MXU accumulation.
    h = jnp.dot(x_ref[...], w1_ref[...], preferred_element_type=jnp.float32)
    h = jnp.maximum(h + b1_ref[...], 0.0)                       # ReLU on the VPU (f32)

    # Fused heads: one lane-dense MXU pass, (TN, Hp) @ (Hp, 128) -> (TN, 128).
    # Columns [0:A) = policy logits, column A = value, columns (A:128) = zero padding.
    logits = jnp.dot(h.astype(wh_ref.dtype), wh_ref[...],
                     preferred_element_type=jnp.float32) + bh_ref[...]

    col = jax.lax.broadcasted_iota(jnp.int32, logits.shape, 1)
    plogits = jnp.where(col < num_act, logits, -jnp.inf)        # mask padded lanes
    m = jnp.max(plogits, axis=-1, keepdims=True)
    e = jnp.exp(plogits - m)                                    # exp(-inf)=0 in padding
    denom = jnp.sum(e, axis=-1, keepdims=True)
    priors = e * pl.reciprocal(denom)                           # exact: keeps row-sum==1 tight

    # Single lane-dense output slab: priors in [:, :A], raw value in [:, A], zeros after.
    out_ref[...] = jnp.where(col == num_act, logits, priors)


@jax.jit
def compute_priors_and_values(obs, params):
    """obs: (N, C, H, W) float32 (NCHW, PyTorch convention). Returns (priors, value)."""
    n = obs.shape[0]
    feat = math.prod(obs.shape[1:])
    hidden = params["w1"].shape[1]
    num_act = params["wp"].shape[1]

    itemsize = jnp.dtype(_MATMUL_DTYPE).itemsize
    feat_p = _round_up(feat, _LANE)
    hid_p = _round_up(hidden, _LANE)
    outw = _round_up(num_act + 1, _LANE)          # fused policy+value head width (lane-dense)

    # Batch tile: multiple of the (packed) sublane count, sized so the double-buffered
    # x stream stays ~16 MiB (fits v7x's 64 MiB VMEM with plenty of headroom).
    sub = _SUBLANE * max(1, 4 // itemsize)        # 8 for f32, 16 for bf16
    budget = 16 * 1024 * 1024
    tn = max(sub, min(512, (budget // (2 * feat_p * itemsize)) // sub * sub))
    tn = min(tn, _round_up(n, sub))
    n_p = _round_up(n, tn)

    # Flatten NCHW row-major (same order as torch .view(N, -1)); zero-pad; cast to bf16.
    x = obs.reshape(n, feat)
    x = jnp.pad(x, ((0, n_p - n), (0, feat_p - feat))).astype(_MATMUL_DTYPE)

    w1 = jnp.pad(params["w1"], ((0, feat_p - feat), (0, hid_p - hidden))).astype(_MATMUL_DTYPE)
    b1 = jnp.pad(params["b1"].reshape(1, -1), ((0, 0), (0, hid_p - hidden))).astype(jnp.float32)

    # Fuse policy + value weights into one (Hp, 128) matrix (zero padding is inert).
    wh = jnp.concatenate([params["wp"], params["wv"]], axis=1)            # (H, A+1)
    wh = jnp.pad(wh, ((0, hid_p - hidden), (0, outw - (num_act + 1)))).astype(_MATMUL_DTYPE)
    bh = jnp.concatenate([params["bp"].reshape(1, -1), params["bv"].reshape(1, -1)], axis=1)
    bh = jnp.pad(bh, ((0, 0), (0, outw - (num_act + 1)))).astype(jnp.float32)

    # Conservative VMEM estimate (x/out double-buffered; weights counted twice for safety),
    # clamped to v7x's 64 MiB physical VMEM.
    vmem_bytes = (2 * tn * feat_p * itemsize
                  + 2 * tn * outw * 4
                  + 2 * feat_p * hid_p * itemsize
                  + 2 * hid_p * outw * itemsize
                  + 2 * (hid_p + outw) * 4)
    vmem_limit = int(min(64 << 20, max(32 << 20, vmem_bytes + (4 << 20))))

    cost = pl.CostEstimate(
        flops=2 * n_p * feat_p * hid_p + 2 * n_p * hid_p * outw,
        transcendentals=n_p * outw,
        bytes_accessed=(n_p * feat_p + feat_p * hid_p + hid_p * outw) * itemsize
                       + n_p * outw * 4,
    )

    out = pl.pallas_call(
        functools.partial(_fused_kernel, num_act=num_act),
        out_shape=jax.ShapeDtypeStruct((n_p, outw), jnp.float32),
        grid=(n_p // tn,),
        in_specs=[
            pl.BlockSpec((tn, feat_p), lambda i: (i, 0)),       # x: batch-tiled, pipelined
            pl.BlockSpec((feat_p, hid_p), lambda i: (0, 0)),    # w1: VMEM-resident
            pl.BlockSpec((1, hid_p), lambda i: (0, 0)),         # b1
            pl.BlockSpec((hid_p, outw), lambda i: (0, 0)),      # fused head weights
            pl.BlockSpec((1, outw), lambda i: (0, 0)),          # fused head bias
        ],
        out_specs=pl.BlockSpec((tn, outw), lambda i: (i, 0)),   # lane-dense output slab
        compiler_params=pltpu.CompilerParams(
            dimension_semantics=("parallel",),                  # megacore-shardable batch axis
            vmem_limit_bytes=vmem_limit,
        ),
        cost_estimate=cost,
    )(x, w1, b1, wh, bh)

    priors = out[:n, :num_act]
    value = out[:n, num_act:num_act + 1]
    return priors, value


class BaseModelPallas:
    """Mirror of the PyTorch BaseModel surface (weights dict + compute path)."""

    def __init__(self, config, obs_shape, num_act, device=None, amp=False,
                 hidden=32, seed=0):
        self.config = config
        self.obs_shape = tuple(obs_shape)     # (C, H, W)
        self.num_act = int(num_act)
        self.device = device
        self.amp = amp
        self.hidden = int(hidden)

        feat = obs_shape[0] * obs_shape[1] * obs_shape[2]
        key = jax.random.PRNGKey(seed)
        k1, k2, k3 = jax.random.split(key, 3)
        scale1 = 1.0 / jnp.sqrt(jnp.float32(feat))
        scale2 = 1.0 / jnp.sqrt(jnp.float32(hidden))
        self._params = {
            "w1": jax.random.normal(k1, (feat, hidden), jnp.float32) * scale1,
            "b1": jnp.zeros((1, hidden), jnp.float32),
            "wp": jax.random.normal(k2, (hidden, num_act), jnp.float32) * scale2,
            "bp": jnp.zeros((1, num_act), jnp.float32),
            "wv": jax.random.normal(k3, (hidden, 1), jnp.float32) * scale2,
            "bv": jnp.zeros((1, 1), jnp.float32),
        }

    def forward(self, obs):
        # TODO(synk): abstract in the reference; delegate to the concrete compute path.
        return self.compute_priors_and_values(obs)

    def compute_priors_and_values(self, obs):
        return compute_priors_and_values(obs, self._params)

    def update_weights(self, *args, **kwargs):
        # TODO(synk): abstract (training step) in the reference; not implemented here.
        raise NotImplementedError

    def get_weights(self):
        return {k: jax.device_get(v) for k, v in self._params.items()}

    def set_weights(self, weights):
        self._params = {k: jnp.asarray(v, jnp.float32) for k, v in weights.items()}


def _reference(obs, params):
    """Pure-JAX reference using the same bf16-operand / f32-accumulate contract."""
    n = obs.shape[0]
    x = obs.reshape(n, -1).astype(_MATMUL_DTYPE)
    h = jnp.maximum(
        jnp.dot(x, params["w1"].astype(_MATMUL_DTYPE),
                preferred_element_type=jnp.float32) + params["b1"], 0.0)
    h16 = h.astype(_MATMUL_DTYPE)
    logits = jnp.dot(h16, params["wp"].astype(_MATMUL_DTYPE),
                     preferred_element_type=jnp.float32) + params["bp"]
    priors = jax.nn.softmax(logits, axis=-1)
    value = jnp.dot(h16, params["wv"].astype(_MATMUL_DTYPE),
                    preferred_element_type=jnp.float32) + params["bv"]
    return priors, value


if __name__ == "__main__":
    batch, channels, height, width = 2, 4, 16, 16
    num_act, hidden = 6, 32

    key = jax.random.PRNGKey(0)
    obs = jax.random.normal(key, (batch, channels, height, width), jnp.float32)

    model = BaseModelPallas(config=None, obs_shape=(channels, height, width),
                            num_act=num_act, hidden=hidden, seed=0)
    priors, value = model.compute_priors_and_values(obs)
    priors = jax.block_until_ready(priors)
    value = jax.block_until_ready(value)

    assert priors.shape == (batch, num_act)
    assert value.shape == (batch, 1)
    # softmax rows must sum to 1
    assert bool(jnp.all(jnp.abs(jnp.sum(priors, axis=-1) - 1.0) < 1e-4))

    # compare against a pure-JAX reference (same bf16/f32 contract)
    ref_p, ref_v = _reference(obs, model._params)
    assert bool(jnp.all(jnp.abs(priors - ref_p) < 2e-2))
    assert bool(jnp.all(jnp.abs(value - ref_v) < 2e-2))

    print("KERNEL_OK")
</pallas_src>

<mosaic_0001>
module attributes {stable_mosaic.version = 11 : i64} {
  func.func @_fused_kernel(%arg0: i32, %arg1: memref<16x1024xbf16, #tpu.memory_space<vmem>>, %arg2: memref<1024x128xbf16, #tpu.memory_space<vmem>>, %arg3: memref<1x128xf32, #tpu.memory_space<vmem>>, %arg4: memref<128x128xbf16, #tpu.memory_space<vmem>>, %arg5: memref<1x128xf32, #tpu.memory_space<vmem>>, %arg6: memref<16x128xf32, #tpu.memory_space<vmem>>) attributes {dimension_semantics = [#tpu.dimension_semantics<parallel>], iteration_bounds = array<i64: 1>, scalar_prefetch = 0 : i64, scratch_operands = 0 : i64, tpu.core_type = #tpu.core_type<tc>, window_params = [{transform_indices = @transform_0, window_bounds = array<i64: 16, 1024>}, {pipeline_mode = #tpu.pipeline_mode<synchronous>, transform_indices = @transform_1, window_bounds = array<i64: 1024, 128>}, {pipeline_mode = #tpu.pipeline_mode<synchronous>, transform_indices = @transform_2, window_bounds = array<i64: 1, 128>}, {pipeline_mode = #tpu.pipeline_mode<synchronous>, transform_indices = @transform_3, window_bounds = array<i64: 128, 128>}, {pipeline_mode = #tpu.pipeline_mode<synchronous>, transform_indices = @transform_4, window_bounds = array<i64: 1, 128>}, {transform_indices = @transform_5, window_bounds = array<i64: 16, 128>}]} {
    %c0 = arith.constant 0 : index
    %c0_0 = arith.constant 0 : index
    %0 = vector.load %arg1[%c0, %c0_0] : memref<16x1024xbf16, #tpu.memory_space<vmem>>, vector<16x1024xbf16>
    %c0_1 = arith.constant 0 : index
    %c0_2 = arith.constant 0 : index
    %1 = vector.load %arg2[%c0_1, %c0_2] : memref<1024x128xbf16, #tpu.memory_space<vmem>>, vector<1024x128xbf16>
    %cst = arith.constant dense<0.000000e+00> : vector<16x128xf32>
    %2 = tpu.matmul %0, %1, %cst {dimension_numbers = #tpu.dot_dimension_numbers<[1], [0], [0], [1], [0, 0, 1, 1], [], []>} : vector<16x1024xbf16>, vector<1024x128xbf16>, vector<16x128xf32> -> vector<16x128xf32>
    %c0_3 = arith.constant 0 : index
    %c0_4 = arith.constant 0 : index
    %3 = vector.load %arg3[%c0_3, %c0_4] : memref<1x128xf32, #tpu.memory_space<vmem>>, vector<1x128xf32>
    %4 = vector.broadcast %3 : vector<1x128xf32> to vector<16x128xf32>
    %5 = arith.addf %2, %4 : vector<16x128xf32>
    %cst_5 = arith.constant 0.000000e+00 : f32
    %6 = vector.broadcast %cst_5 : f32 to vector<16x128xf32>
    %7 = arith.maximumf %5, %6 : vector<16x128xf32>
    %8 = arith.truncf %7 : vector<16x128xf32> to vector<16x128xbf16>
    %c0_6 = arith.constant 0 : index
    %c0_7 = arith.constant 0 : index
    %9 = vector.load %arg4[%c0_6, %c0_7] : memref<128x128xbf16, #tpu.memory_space<vmem>>, vector<128x128xbf16>
    %cst_8 = arith.constant dense<0.000000e+00> : vector<16x128xf32>
    %10 = tpu.matmul %8, %9, %cst_8 {dimension_numbers = #tpu.dot_dimension_numbers<[1], [0], [0], [1], [0, 0, 1, 1], [], []>} : vector<16x128xbf16>, vector<128x128xbf16>, vector<16x128xf32> -> vector<16x128xf32>
    %c0_9 = arith.constant 0 : index
    %c0_10 = arith.constant 0 : index
    %11 = vector.load %arg5[%c0_9, %c0_10] : memref<1x128xf32, #tpu.memory_space<vmem>>, vector<1x128xf32>
    %12 = vector.broadcast %11 : vector<1x128xf32> to vector<16x128xf32>
    %13 = arith.addf %10, %12 : vector<16x128xf32>
    %14 = tpu.iota {dimensions = array<i32: 1>} : vector<16x128xi32>
    %c6_i32 = arith.constant 6 : i32
    %15 = vector.broadcast %c6_i32 : i32 to vector<16x128xi32>
    %16 = arith.cmpi slt, %14, %15 : vector<16x128xi32>
    %cst_11 = arith.constant 0xFF800000 : f32
    %17 = vector.broadcast %cst_11 : f32 to vector<16x128xf32>
    %18 = arith.select %16, %13, %17 : vector<16x128xi1>, vector<16x128xf32>
    %cst_12 = arith.constant dense<0xFF800000> : vector<16xf32>
    %19 = vector.multi_reduction <maximumf>, %18, %cst_12 [1] : vector<16x128xf32> to vector<16xf32>
    %20 = vector.shape_cast %19 : vector<16xf32> to vector<16x1xf32>
    %21 = vector.broadcast %20 : vector<16x1xf32> to vector<16x128xf32>
    %22 = arith.subf %18, %21 : vector<16x128xf32>
    %23 = math.exp %22 : vector<16x128xf32>
    %cst_13 = arith.constant dense<0.000000e+00> : vector<16xf32>
    %24 = vector.multi_reduction <add>, %23, %cst_13 [1] : vector<16x128xf32> to vector<16xf32>
    %25 = vector.shape_cast %24 : vector<16xf32> to vector<16x1xf32>
    %26 = tpu.reciprocal %25 : vector<16x1xf32> -> vector<16x1xf32>
    %27 = vector.broadcast %26 : vector<16x1xf32> to vector<16x128xf32>
    %28 = arith.mulf %23, %27 : vector<16x128xf32>
    %c6_i32_14 = arith.constant 6 : i32
    %29 = vector.broadcast %c6_i32_14 : i32 to vector<16x128xi32>
    %30 = arith.cmpi eq, %14, %29 : vector<16x128xi32>
    %31 = arith.select %30, %13, %28 : vector<16x128xi1>, vector<16x128xf32>
    %c0_15 = arith.constant 0 : index
    %c0_16 = arith.constant 0 : index
    %32 = vector.load %arg6[%c0_15, %c0_16] : memref<16x128xf32, #tpu.memory_space<vmem>>, vector<16x128xf32>
    tpu.vector_store %arg6[%c0_15, %c0_16], %31 {strides = array<i32>} : memref<16x128xf32, #tpu.memory_space<vmem>>, vector<16x128xf32>,
    return
  }
  func.func @transform_0(%arg0: i32) -> (i32, i32) {
    %c0_i32 = arith.constant 0 : i32
    %c0_i32_0 = arith.constant 0 : i32
    return %arg0, %c0_i32 : i32, i32
  }
  func.func @transform_1(%arg0: i32) -> (i32, i32) {
    %c0_i32 = arith.constant 0 : i32
    %c0_i32_0 = arith.constant 0 : i32
    %c0_i32_1 = arith.constant 0 : i32
    return %c0_i32, %c0_i32_0 : i32, i32
  }
  func.func @transform_2(%arg0: i32) -> (i32, i32) {
    %c0_i32 = arith.constant 0 : i32
    %c0_i32_0 = arith.constant 0 : i32
    %c0_i32_1 = arith.constant 0 : i32
    return %c0_i32, %c0_i32_0 : i32, i32
  }
  func.func @transform_3(%arg0: i32) -> (i32, i32) {
    %c0_i32 = arith.constant 0 : i32
    %c0_i32_0 = arith.constant 0 : i32
    %c0_i32_1 = arith.constant 0 : i32
    return %c0_i32, %c0_i32_0 : i32, i32
  }
  func.func @transform_4(%arg0: i32) -> (i32, i32) {
    %c0_i32 = arith.constant 0 : i32
    %c0_i32_0 = arith.constant 0 : i32
    %c0_i32_1 = arith.constant 0 : i32
    return %c0_i32, %c0_i32_0 : i32, i32
  }
  func.func @transform_5(%arg0: i32) -> (i32, i32) {
    %c0_i32 = arith.constant 0 : i32
    %c0_i32_0 = arith.constant 0 : i32
    return %arg0, %c0_i32 : i32, i32
  }
}

</mosaic_0001>

<bundles_post_ra>
// kernel: compute_priors_and_values.1
= control target key start
LH: loop header
LB: loop body
LE: loop exit
PB: predicated region body
PF: predicated region fallthrough
CT: control target
= control target key end

     0   :  { %s1563_s1 = inlined_call_operand.vmem [shape: bf16[1024,128], index: 1, kind: input, shape index: {}]   ;;  %s1564_s2 = inlined_call_operand.vmem [shape: f32[1,128], index: 2, kind: input, shape index: {}]   ;;  %s1565_s0 = inlined_call_operand.vmem [shape: bf16[16,1024], index: 0, kind: input, shape index: {}]   ;;  %s1566_s4 = inlined_call_operand.vmem [shape: f32[1,128], index: 4, kind: input, shape index: {}]   ;;  %s1567_s3 = inlined_call_operand.vmem [shape: bf16[128,128], index: 3, kind: input, shape index: {}]   ;;  %s1568_s5 = inlined_call_operand.vmem [shape: f32[16,128], index: 5, kind: output, shape index: {}]  }
   0x1   :  { %v1174_v0 = vld [vmem:[%s1563_s1 + $0x38] sm:$0xff]  ;;  %v1173_v4 = vld [vmem:[%s1563_s1 + $0x30] sm:$0xff]  ;;  %v1172_v8 = vld [vmem:[%s1563_s1 + $0x28] sm:$0xff] }
   0x2   :  { %v1182_v1 = vld [vmem:[%s1563_s1 + $0x78] sm:$0xff]  ;;  %584 = vmatpush.bf16.msra.mxu0 %v1174_v0  ;;  %v1181_v5 = vld [vmem:[%s1563_s1 + $0x70] sm:$0xff]  ;;  %v1180_v9 = vld [vmem:[%s1563_s1 + $0x68] sm:$0xff] }
   0x3   :  { %v1190_v2 = vld [vmem:[%s1563_s1 + $0xb8] sm:$0xff]  ;;  %598 = vmatpush.bf16.msra.mxu1 %v1182_v1  ;;  %v1189_v6 = vld [vmem:[%s1563_s1 + $0xb0] sm:$0xff]  ;;  %v1188_v10 = vld [vmem:[%s1563_s1 + $0xa8] sm:$0xff] }
   0x4   :  { %v1198_v3 = vld [vmem:[%s1563_s1 + $0xf8] sm:$0xff]  ;;  %612 = vmatpush.bf16.msra.mxu2 %v1190_v2  ;;  %v1197_v7 = vld [vmem:[%s1563_s1 + $0xf0] sm:$0xff]  ;;  %v1196_v11 = vld [vmem:[%s1563_s1 + $0xe8] sm:$0xff] }
   0x5   :  { %626 = vmatpush.bf16.msra.mxu3 %v1198_v3  ;;  %v1171_v12 = vld [vmem:[%s1563_s1 + $0x20] sm:$0xff]  ;;  %v1170_v16 = vld [vmem:[%s1563_s1 + $0x18] sm:$0xff]  ;;  %v1169_v20 = vld [vmem:[%s1563_s1 + $0x10] sm:$0xff] }
   0x6   :  { %585 = vmatpush.bf16.msra.mxu0 %v1173_v4  ;;  %v1179_v13 = vld [vmem:[%s1563_s1 + $0x60] sm:$0xff]  ;;  %v1178_v17 = vld [vmem:[%s1563_s1 + $0x58] sm:$0xff]  ;;  %v1177_v21 = vld [vmem:[%s1563_s1 + $0x50] sm:$0xff] }
   0x7   :  { %599 = vmatpush.bf16.msra.mxu1 %v1181_v5  ;;  %v1187_v14 = vld [vmem:[%s1563_s1 + $0xa0] sm:$0xff]  ;;  %v1186_v18 = vld [vmem:[%s1563_s1 + $0x98] sm:$0xff]  ;;  %v1185_v22 = vld [vmem:[%s1563_s1 + $0x90] sm:$0xff] }
   0x8   :  { %613 = vmatpush.bf16.msra.mxu2 %v1189_v6  ;;  %v1195_v15 = vld [vmem:[%s1563_s1 + $0xe0] sm:$0xff]  ;;  %v1194_v19 = vld [vmem:[%s1563_s1 + $0xd8] sm:$0xff]  ;;  %v1193_v23 = vld [vmem:[%s1563_s1 + $0xd0] sm:$0xff] }
   0x9   :  { %627 = vmatpush.bf16.msra.mxu3 %v1197_v7  ;;  %v1168_v24 = vld [vmem:[%s1563_s1 + $0x8] sm:$0xff]  ;;  %v1167_v28 = vld [vmem:[%s1563_s1] sm:$0xff]  ;;  %v1206_v32 = vld [vmem:[%s1563_s1 + $0x138] sm:$0xff] }
   0xa   :  { %586 = vmatpush.bf16.msra.mxu0 %v1172_v8  ;;  %v1176_v25 = vld [vmem:[%s1563_s1 + $0x48] sm:$0xff]  ;;  %v1175_v29 = vld [vmem:[%s1563_s1 + $0x40] sm:$0xff]  ;;  %v1214_v33 = vld [vmem:[%s1563_s1 + $0x178] sm:$0xff] }
   0xb   :  { %600 = vmatpush.bf16.msra.mxu1 %v1180_v9  ;;  %v1184_v26 = vld [vmem:[%s1563_s1 + $0x88] sm:$0xff]  ;;  %v1183_v30 = vld [vmem:[%s1563_s1 + $0x80] sm:$0xff]  ;;  %v1222_v42 = vld [vmem:[%s1563_s1 + $0x1b8] sm:$0xff] }
   0xc   :  { %614 = vmatpush.bf16.msra.mxu2 %v1188_v10  ;;  %v1192_v27 = vld [vmem:[%s1563_s1 + $0xc8] sm:$0xff]  ;;  %v1191_v31 = vld [vmem:[%s1563_s1 + $0xc0] sm:$0xff]  ;;  %v1230_v43 = vld [vmem:[%s1563_s1 + $0x1f8] sm:$0xff] }
   0xd   :  { %628 = vmatpush.bf16.msra.mxu3 %v1196_v11  ;;  %v849_v34 = vld [vmem:[%s1565_s0 + $0x8] sm:$0xf]  ;;  %v841_v36 = vld [vmem:[%s1565_s0] sm:$0xf]  ;;  %v1160_v38 = vld [vmem:[%s1565_s0 + $0xc] sm:$0xf] }
   0xe   :  { %587 = vmatpush.bf16.msra.mxu0 %v1171_v12  ;;  %v1164_v35 = vld [vmem:[%s1565_s0 + $0x24] sm:$0xf0]  ;;  %v1163_v37 = vld [vmem:[%s1565_s0 + $0x1c] sm:$0xf0]  ;;  %v851_v39 = vld [vmem:[%s1565_s0 + $0x28] sm:$0xf0] }
   0xf   :  { %601 = vmatpush.bf16.msra.mxu1 %v1179_v13  ;;  %v1159_v40 = vld [vmem:[%s1565_s0 + $0x4] sm:$0xf]  ;;  %v850_v44 = vor.u32 %v1164_v35, %v849_v34  ;;  %v842_v45 = vor.u32 %v1163_v37, %v841_v36  ;;  %v854_v46 = vor.u32 %v1160_v38, %v851_v39  ;;  %v1205_v48 = vld [vmem:[%s1563_s1 + $0x130] sm:$0xff]  ;;  %v1204_v52 = vld [vmem:[%s1563_s1 + $0x128] sm:$0xff] }
  0x10   :  { %615 = vmatpush.bf16.msra.mxu2 %v1187_v14  ;;  %v843_v41 = vld [vmem:[%s1565_s0 + $0x20] sm:$0xf0]  ;;  %v1213_v49 = vld [vmem:[%s1563_s1 + $0x170] sm:$0xff]  ;;  %v1212_v53 = vld [vmem:[%s1563_s1 + $0x168] sm:$0xff] }
  0x11   :  { %629 = vmatpush.bf16.msra.mxu3 %v1195_v15  ;;  %v846_v47 = vor.u32 %v1159_v40, %v843_v41  ;;  %v1221_v50 = vld [vmem:[%s1563_s1 + $0x1b0] sm:$0xff]  ;;  %v1220_v54 = vld [vmem:[%s1563_s1 + $0x1a8] sm:$0xff]  ;;  %v1203_v56 = vld [vmem:[%s1563_s1 + $0x120] sm:$0xff] }
  0x12   :  { %588 = vmatpush.bf16.msra.mxu0 %v1170_v16  ;;  %v1229_v51 = vld [vmem:[%s1563_s1 + $0x1f0] sm:$0xff]  ;;  %v1228_v55 = vld [vmem:[%s1563_s1 + $0x1e8] sm:$0xff]  ;;  %v1211_v57 = vld [vmem:[%s1563_s1 + $0x160] sm:$0xff] }
  0x13   :  { %602 = vmatpush.bf16.msra.mxu1 %v1178_v17  ;;  %v1219_v58 = vld [vmem:[%s1563_s1 + $0x1a0] sm:$0xff]  ;;  %v1202_v60 = vld [vmem:[%s1563_s1 + $0x118] sm:$0xff]  ;;  %v1201_v0 = vld [vmem:[%s1563_s1 + $0x110] sm:$0xff] }
  0x14   :  { %616 = vmatpush.bf16.msra.mxu2 %v1186_v18  ;;  %v1227_v59 = vld [vmem:[%s1563_s1 + $0x1e0] sm:$0xff]  ;;  %v1210_v61 = vld [vmem:[%s1563_s1 + $0x158] sm:$0xff]  ;;  %v1209_v1 = vld [vmem:[%s1563_s1 + $0x150] sm:$0xff] }
  0x15   :  { %630 = vmatpush.bf16.msra.mxu3 %v1194_v19  ;;  %v1218_v62 = vld [vmem:[%s1563_s1 + $0x198] sm:$0xff]  ;;  %v1217_v2 = vld [vmem:[%s1563_s1 + $0x190] sm:$0xff]  ;;  %v1200_v4 = vld [vmem:[%s1563_s1 + $0x108] sm:$0xff] }
  0x16   :  { %589 = vmatpush.bf16.msra.mxu0 %v1169_v20  ;;  %v1226_v63 = vld [vmem:[%s1563_s1 + $0x1d8] sm:$0xff]  ;;  %v1225_v3 = vld [vmem:[%s1563_s1 + $0x1d0] sm:$0xff]  ;;  %v1208_v5 = vld [vmem:[%s1563_s1 + $0x148] sm:$0xff] }
  0x17   :  { %603 = vmatpush.bf16.msra.mxu1 %v1177_v21  ;;  %v1216_v6 = vld [vmem:[%s1563_s1 + $0x188] sm:$0xff]  ;;  %v1199_v8 = vld [vmem:[%s1563_s1 + $0x100] sm:$0xff]  ;;  %v857_v12 = vld [vmem:[%s1565_s0 + $0x10] sm:$0xf] }
  0x18   :  { %617 = vmatpush.bf16.msra.mxu2 %v1185_v22  ;;  %v1224_v7 = vld [vmem:[%s1563_s1 + $0x1c8] sm:$0xff]  ;;  %v1207_v9 = vld [vmem:[%s1563_s1 + $0x140] sm:$0xff]  ;;  %v1165_v13 = vld [vmem:[%s1565_s0 + $0x2c] sm:$0xf0] }
  0x19   :  { %631 = vmatpush.bf16.msra.mxu3 %v1193_v23  ;;  %v1215_v10 = vld [vmem:[%s1563_s1 + $0x180] sm:$0xff]  ;;  %v1161_v14 = vld [vmem:[%s1565_s0 + $0x14] sm:$0xf]  ;;  %v865_v16 = vld [vmem:[%s1565_s0 + $0x18] sm:$0xf]  ;;  %v858_v20 = vor.u32 %v1165_v13, %v857_v12 }
  0x1a   :  { %590 = vmatpush.bf16.msra.mxu0 %v1168_v24  ;;  %v1223_v11 = vld [vmem:[%s1563_s1 + $0x1c0] sm:$0xff]  ;;  %v859_v15 = vld [vmem:[%s1565_s0 + $0x30] sm:$0xf0]  ;;  %v1166_v17 = vld [vmem:[%s1565_s0 + $0x34] sm:$0xf0] }
  0x1b   :  { %604 = vmatpush.bf16.msra.mxu1 %v1176_v25  ;;  %v1162_v18 = vld [vmem:[%s1565_s0 + $0x1c] sm:$0xf]  ;;  %v862_v21 = vor.u32 %v1161_v14, %v859_v15  ;;  %v866_v22 = vor.u32 %v1166_v17, %v865_v16  ;;  %v1237_v25 = vld [vmem:[%s1567_s3 + $0x30] sm:$0xff]  ;;  %v1239_v34 = vld [vmem:[%s1564_s2] ss:$0 sm:$0xff] }
  0x1c   :  { %618 = vmatpush.bf16.msra.mxu2 %v1184_v26  ;;  %v867_v19 = vld [vmem:[%s1565_s0 + $0x38] sm:$0xf0]  ;;  %v1236_v26 = vld [vmem:[%s1567_s3 + $0x28] sm:$0xff] }
  0x1d   :  { %632 = vmatpush.bf16.msra.mxu3 %v1192_v27  ;;  %v870_v23 = vor.u32 %v1162_v18, %v867_v19  ;;  %v1238_v24 = vld [vmem:[%s1567_s3 + $0x38] sm:$0xff]  ;;  %v1235_v27 = vld [vmem:[%s1567_s3 + $0x20] sm:$0xff] }
  0x1e   :  { %591 = vmatpush.bf16.msra.mxu0 %v1167_v28  ;;  %v1234_v28 = vld [vmem:[%s1567_s3 + $0x18] sm:$0xff] }
  0x1f   :  { %605 = vmatpush.bf16.msra.mxu1 %v1175_v29  ;;  %v1233_v29 = vld [vmem:[%s1567_s3 + $0x10] sm:$0xff] }
  0x20   :  { %619 = vmatpush.bf16.msra.mxu2 %v1183_v30 }
  0x21   :  { %633 = vmatpush.bf16.msra.mxu3 %v1191_v31  ;;  %592 = vmatmul.bf16.vlgmr.msra.gmra.mxu0 %v842_v45  ;;  %v1232_v31 = vld [vmem:[%s1567_s3 + $0x8] sm:$0xff] }
  0x22   :  { %640 = vmatpush.bf16.msrb.mxu0 %v1206_v32  ;;  %606 = vmatmul.bf16.vlgmr.msra.gmra.mxu1 %v846_v47 }
  0x23   :  { %654 = vmatpush.bf16.msrb.mxu1 %v1214_v33  ;;  %620 = vmatmul.bf16.vlgmr.msra.gmra.mxu2 %v850_v44  ;;  %v1231_v33 = vld [vmem:[%s1567_s3] sm:$0xff] }
  0x24   :  { %668 = vmatpush.bf16.msrb.mxu2 %v1222_v42  ;;  %634 = vmatmul.bf16.vlgmr.msra.gmra.mxu3 %v854_v46 }
  0x25   :  { %682 = vmatpush.bf16.msrb.mxu3 %v1230_v43 }
  0x26   :  { %641 = vmatpush.bf16.msrb.mxu0 %v1205_v48 }
  0x27   :  { %655 = vmatpush.bf16.msrb.mxu1 %v1213_v49 }
  0x28   :  { %669 = vmatpush.bf16.msrb.mxu2 %v1221_v50 }
  0x29   :  { %683 = vmatpush.bf16.msrb.mxu3 %v1229_v51 }
  0x2a   :  { %642 = vmatpush.bf16.msrb.mxu0 %v1204_v52 }
  0x2b   :  { %656 = vmatpush.bf16.msrb.mxu1 %v1212_v53 }
  0x2c   :  { %670 = vmatpush.bf16.msrb.mxu2 %v1220_v54 }
  0x2d   :  { %684 = vmatpush.bf16.msrb.mxu3 %v1228_v55 }
  0x2e   :  { %643 = vmatpush.bf16.msrb.mxu0 %v1203_v56 }
  0x2f   :  { %657 = vmatpush.bf16.msrb.mxu1 %v1211_v57 }
  0x30   :  { %671 = vmatpush.bf16.msrb.mxu2 %v1219_v58 }
  0x31   :  { %685 = vmatpush.bf16.msrb.mxu3 %v1227_v59 }
  0x32   :  { %644 = vmatpush.bf16.msrb.mxu0 %v1202_v60 }
  0x33   :  { %658 = vmatpush.bf16.msrb.mxu1 %v1210_v61 }
  0x34   :  { %672 = vmatpush.bf16.msrb.mxu2 %v1218_v62 }
  0x35   :  { %686 = vmatpush.bf16.msrb.mxu3 %v1226_v63 }
  0x36   :  { %645 = vmatpush.bf16.msrb.mxu0 %v1201_v0 }
  0x37   :  { %659 = vmatpush.bf16.msrb.mxu1 %v1209_v1 }
  0x38   :  { %673 = vmatpush.bf16.msrb.mxu2 %v1217_v2 }
  0x39   :  { %687 = vmatpush.bf16.msrb.mxu3 %v1225_v3 }
  0x3a   :  { %646 = vmatpush.bf16.msrb.mxu0 %v1200_v4  ;;  %v781_v4 = vlaneseq }
  0x3b   :  { %660 = vmatpush.bf16.msrb.mxu1 %v1208_v5 }
  0x3c   :  { %674 = vmatpush.bf16.msrb.mxu2 %v1216_v6  ;;  %v1546_v5 = vand.u32 127, %v781_v4  ;;  %v1240_v6 = vld [vmem:[%s1566_s4] ss:$0 sm:$0xff] }
  0x3d   :  { %688 = vmatpush.bf16.msrb.mxu3 %v1224_v7 }
  0x3e   :  { %647 = vmatpush.bf16.msrb.mxu0 %v1199_v8  ;;  %vm783_vm0 = vcmp.lt.s32.totalorder %v1546_v5, 6  ;;  %vm830_vm5 = vcmp.eq.s32.totalorder %v1546_v5, 6 }
  0x3f   :  { %661 = vmatpush.bf16.msrb.mxu1 %v1207_v9 }
  0x40   :  { %675 = vmatpush.bf16.msrb.mxu2 %v1215_v10 }
  0x41   :  { %689 = vmatpush.bf16.msrb.mxu3 %v1223_v11  ;;  %648 = vmatmul.bf16.vlgmr.msrb.gmra.mxu0 %v858_v20 }
  0x42   :  { %662 = vmatmul.bf16.vlgmr.msrb.gmra.mxu1 %v862_v21  ;;  %767 = vmatpush.bf16.msra.mxu0 %v1238_v24 }
  0x43   :  { %676 = vmatmul.bf16.vlgmr.msrb.gmra.mxu2 %v866_v22 }
  0x44   :  { %690 = vmatmul.bf16.vlgmr.msrb.gmra.mxu3 %v870_v23 }
  0x46   :  { %768 = vmatpush.bf16.msra.mxu0 %v1237_v25 }
  0x4a   :  { %769 = vmatpush.bf16.msra.mxu0 %v1236_v26 }
  0x4e   :  { %770 = vmatpush.bf16.msra.mxu0 %v1235_v27 }
  0x52   :  { %771 = vmatpush.bf16.msra.mxu0 %v1234_v28 }
  0x56   :  { %772 = vmatpush.bf16.msra.mxu0 %v1233_v29 }
  0x5a   :  { %773 = vmatpush.bf16.msra.mxu0 %v1232_v31 }
  0x5e   :  { %774 = vmatpush.bf16.msra.mxu0 %v1231_v33 }
  0x9e   :  { %v593_v30 = vpop.f32.mrf.mxu0 }
  0x9f   :  { %v607_v32 = vpop.f32.mrf.mxu1  ;;  %v594_v37 = vadd.f32 %v1239_v34, %v593_v30 }
  0xa1   :  { %v608_v40 = vadd.f32 %v607_v32, %v594_v37 }
  0xa6   :  { %v621_v35 = vpop.f32.mrf.mxu2  ;;  %v595_v38 = vpop.f32.mrf.mxu0 }
  0xa7   :  { %v635_v36 = vpop.f32.mrf.mxu3  ;;  %v609_v39 = vpop.f32.mrf.mxu1  ;;  %v596_v41 = vadd.f32 %v1239_v34, %v595_v38  ;;  %v622_v44 = vadd.f32 %v621_v35, %v608_v40 }
  0xa9   :  { %v610_v45 = vadd.f32 %v609_v39, %v596_v41  ;;  %v636_v48 = vadd.f32 %v635_v36, %v622_v44 }
  0xae   :  { %v623_v42 = vpop.f32.mrf.mxu2 }
  0xaf   :  { %v637_v43 = vpop.f32.mrf.mxu3  ;;  %v624_v49 = vadd.f32 %v623_v42, %v610_v45 }
  0xb1   :  { %v638_v53 = vadd.f32 %v637_v43, %v624_v49 }
  0xbe   :  { %v649_v46 = vpop.f32.mrf.mxu0 }
  0xbf   :  { %v663_v47 = vpop.f32.mrf.mxu1  ;;  %v650_v50 = vadd.f32 %v649_v46, %v636_v48 }
  0xc1   :  { %v664_v55 = vadd.f32 %v663_v47, %v650_v50 }
  0xc6   :  { %v677_v51 = vpop.f32.mrf.mxu2  ;;  %v651_v54 = vpop.f32.mrf.mxu0 }
  0xc7   :  { %v691_v52 = vpop.f32.mrf.mxu3  ;;  %v652_v56 = vadd.f32 %v651_v54, %v638_v53  ;;  %v678_v57 = vadd.f32 %v677_v51, %v664_v55  ;;  %v665_v58 = vpop.f32.mrf.mxu1 }
  0xc9   :  { %v666_v59 = vadd.f32 %v665_v58, %v652_v56  ;;  %v692_v61 = vadd.f32 %v691_v52, %v678_v57 }
  0xcb   :  { %v696_v1 = vmax.f32 %v692_v61, 0.0 }
  0xce   :  { %v679_v60 = vpop.f32.mrf.mxu2 }
  0xcf   :  { %v680_v62 = vadd.f32 %v679_v60, %v666_v59  ;;  %v693_v63 = vpop.f32.mrf.mxu3 }
  0xd1   :  { %v694_v0 = vadd.f32 %v693_v63, %v680_v62 }
  0xd3   :  { %v697_v2 = vmax.f32 %v694_v0, 0.0 }
  0xd5   :  { %v698_v3 = vpack.c.bf16 %v697_v2, %v696_v1 }
  0xd7   :  { %775 = vmatmul.bf16.vlgmr.msra.gmra.mxu0 %v698_v3 }
 0x154   :  { %v776_v7 = vpop.f32.mrf.mxu0 }
 0x155   :  { %v777_v8 = vadd.f32 %v1240_v6, %v776_v7 }
 0x157   :  { %v784_v9 = vsel %vm783_vm0, %v777_v8, -inf }
 0x158   :  { %786 = vmax.xlane.f32.xlu0 %v784_v9 }
 0x15c   :  { %v778_v10 = vpop.f32.mrf.mxu0 }
 0x15d   :  { %v779_v11 = vadd.f32 %v1240_v6, %v778_v10 }
 0x15f   :  { %v785_v12 = vsel %vm783_vm0, %v779_v11, -inf }
 0x160   :  { %788 = vmax.xlane.f32.xlu0 %v785_v12 }
 0x1cb   :  { %v787_v13 = vpop.xlane.xlu0 %786 }
 0x1cc   :  { %v790_v14 = vsub.f32 %v784_v9, %v787_v13 }
 0x1ce   :  { %v792_v15 = vmul.f32 1.442695, %v790_v14 }
 0x1d0   :  { %1241 = vpow2.f32 %v792_v15 }
 0x1d3   :  { %v789_v16 = vpop.xlane.xlu0 %788 }
 0x1d4   :  { %v791_v17 = vsub.f32 %v785_v12, %v789_v16 }
 0x1d6   :  { %v1242_v18 = vpop.eup %1241  ;;  %v794_v19 = vmul.f32 1.442695, %v791_v17 }
 0x1d7   :  { %796 = vadd.xlane.f32.xlu1 %v1242_v18 }
 0x1d8   :  { %1243 = vpow2.f32 %v794_v19 }
 0x1de   :  { %v1244_v20 = vpop.eup %1243 }
 0x1df   :  { %798 = vadd.xlane.f32.xlu1 %v1244_v20 }
 0x24a   :  { %v797_v21 = vpop.xlane.xlu1 %796 }
 0x24b   :  { %1245 = vrcp.f32 %v797_v21  ;;  %v811_v26 = vand.u32 2147483648, %v797_v21  ;;  %v809_v28 = vand.u32 2147483647, %v797_v21  ;;  %vm805_vm2 = vweird.f32 %v797_v21 }
 0x24d   :  { %v812_v31 = vor.u32 1.1754944e-38, %v811_v26  ;;  %vm810_vm4 = vcmp.eq.f32.partialorder %v809_v28, 8.507059e+37 }
 0x251   :  { %v1246_v22 = vpop.eup %1245 }
 0x252   :  { %v801_v23 = vmul.f32 %v1246_v22, %v797_v21  ;;  %v799_v24 = vpop.xlane.xlu1 %798  ;;  %vm806_vm1 = vweird.f32 %v1246_v22 }
 0x253   :  { %1247 = vrcp.f32 %v799_v24  ;;  %vm807_vm3 = vmor %vm805_vm2, %vm806_vm1  ;;  %v825_v37 = vand.u32 2147483648, %v799_v24  ;;  %v823_v40 = vand.u32 2147483647, %v799_v24  ;;  %vm819_vm7 = vweird.f32 %v799_v24 }
 0x254   :  { %v802_v25 = vsub.f32 1.0, %v801_v23 }
 0x255   :  { %v826_v42 = vor.u32 1.1754944e-38, %v825_v37  ;;  %vm824_vm9 = vcmp.eq.f32.partialorder %v823_v40, 8.507059e+37 }
 0x256   :  { %v803_v27 = vmul.f32 %v1246_v22, %v802_v25 }
 0x258   :  { %v804_v29 = vadd.f32 %v1246_v22, %v803_v27 }
 0x259   :  { %v1248_v30 = vpop.eup %1247 }
 0x25a   :  { %v808_v32 = vsel %vm807_vm3, %v1246_v22, %v804_v29  ;;  %v815_v33 = vmul.f32 %v1248_v30, %v799_v24  ;;  %vm820_vm6 = vweird.f32 %v1248_v30 }
 0x25b   :  { %v813_v34 = vsel %vm810_vm4, %v812_v31, %v808_v32  ;;  %vm821_vm8 = vmor %vm819_vm7, %vm820_vm6 }
 0x25c   :  { %v828_v35 = vmul.f32 %v1242_v18, %v813_v34  ;;  %v816_v36 = vsub.f32 1.0, %v815_v33 }
 0x25e   :  { %v831_v38 = vsel %vm830_vm5, %v777_v8, %v828_v35  ;;  %v817_v39 = vmul.f32 %v1248_v30, %v816_v36 }
 0x25f   :  { %833 = vst [vmem:[%s1568_s5] sm:$0xff] %v831_v38 }
 0x260   :  { %v818_v41 = vadd.f32 %v1248_v30, %v817_v39 }
 0x262   :  { %v822_v43 = vsel %vm821_vm8, %v1248_v30, %v818_v41 }
 0x263   :  { %v827_v44 = vsel %vm824_vm9, %v826_v42, %v822_v43 }
 0x264   :  { %v829_v45 = vmul.f32 %v1244_v20, %v827_v44 }
 0x266   :  { %v832_v46 = vsel %vm830_vm5, %v779_v11, %v829_v45 }
 0x267   :  { %834 = vst [vmem:[%s1568_s5 + $0x8] sm:$0xff] %v832_v46 }

</bundles_post_ra>
